<compile_context>
chip_gen: v6e
topology: v6e:2x2x1
jax: 0.10.0
libtpu: 0.0.40
codegen_flags: <defaults>
</compile_context>

<pallas_src>
from functools import partial

import jax
import jax.numpy as jnp
from jax.experimental import pallas as pl
from jax.experimental.pallas import tpu as pltpu

_LANE = 128
_MAX_TILE_ROWS = 2048        # 2048x128 f32 = 1 MiB/block/input; x2 inputs x2 bufs = 4 MiB
_VMEM_LIMIT_BYTES = 32 * 1024 * 1024
_EPS = 1e-12


def _int_pow(x, p):
    """x**p as a VPU multiply chain when p is a small non-negative integer."""
    if float(p) == int(p) and 0 <= int(p) <= 16:
        n = int(p)
        if n == 0:
            return jnp.ones_like(x)
        result = None
        base = x
        while n:
            if n & 1:
                result = base if result is None else result * base
            n >>= 1
            if n:
                base = base * base
        return result
    return x ** p   # non-integer exponent: EUP exp/log fallback


def _detect_num_tensorcores():
    """2 TensorCores per chip only on v7x; single TC elsewhere."""
    try:
        kind = jax.devices()[0].device_kind.lower()
    except Exception:
        return 1
    return 2 if "v7" in kind else 1


def _gvfl_neg_kernel(hp_ref, ht_ref, out_ref, acc_ref, *, alpha, gamma,
                     tile_rows, blocks_per_core, valid_rows, mask_needed):
    c = pl.program_id(0)
    j = pl.program_id(1)

    @pl.when(j == 0)
    def _():
        acc_ref[...] = jnp.zeros_like(acc_ref)

    # Cast per-tile in VMEM (VPU slot, free while HBM-bound) instead of in the
    # wrapper, so HBM traffic stays in the native input dtype.
    hp = hp_ref[...].astype(jnp.float32)
    ht = ht_ref[...].astype(jnp.float32)

    neg = (-jnp.log(1.0 - hp + _EPS)
           * _int_pow(hp, alpha)
           * _int_pow(1.0 - ht, gamma))

    def _accum(vals):
        if tile_rows % 8 == 0:
            # Full-vreg accumulator: plain VALU adds; cross-sublane XLU reduce
            # deferred to the epilogue.
            acc_ref[...] += jnp.sum(vals.reshape(tile_rows // 8, 8, _LANE),
                                    axis=0)
        else:
            # Tiny (rows < 8) single-block case only.
            acc_ref[0:1, :] += jnp.sum(vals, axis=0, keepdims=True)

    if mask_needed:
        # Logical (unclamped) starting row of this grid step; blocks past the
        # valid range (partial last block / clamped duplicate block) are masked.
        row0 = (c * blocks_per_core + j) * tile_rows

        @pl.when(row0 + tile_rows <= valid_rows)
        def _():
            _accum(neg)

        @pl.when(row0 + tile_rows > valid_rows)
        def _():
            local_row = jax.lax.broadcasted_iota(jnp.int32, neg.shape, 0)
            # jnp.where also squashes NaN/Inf from garbage reads in the padded
            # region of a partial block.
            _accum(jnp.where(row0 + local_row < valid_rows, neg, 0.0))
    else:
        _accum(neg)

    @pl.when(j == pl.num_programs(1) - 1)
    def _():
        out_ref[...] = jnp.sum(acc_ref[...]).reshape(1, 1, 1)


@partial(jax.jit, static_argnames=("alpha", "gamma", "loss_weight", "n_cores"))
def _gvfl_impl(heatmap_pred, pred_posis, gaussian_target, iou,
               alpha, gamma, loss_weight, n_cores):
    hp = heatmap_pred.reshape(-1)
    ht = gaussian_target.reshape(-1)
    n = hp.shape[0]
    aligned = (n // _LANE) * _LANE

    # ---- ragged tail (< 128 elems): plain JAX, avoids jnp.pad of full tensors
    tail_sum = jnp.float32(0.0)
    if aligned != n:
        # TODO(synk): prefix slice below still materializes a copy; the ragged
        # (numel % 128 != 0) path is rare.
        hp_t = hp[aligned:].astype(jnp.float32)
        ht_t = ht[aligned:].astype(jnp.float32)
        tail_sum = jnp.sum(-jnp.log(1.0 - hp_t + _EPS)
                           * _int_pow(hp_t, alpha)
                           * _int_pow(1.0 - ht_t, gamma))
        hp = hp[:aligned]
        ht = ht[:aligned]

    # ---- negative (heatmap) term: Pallas kernel over a (rows, 128) slab ----
    if aligned == 0:
        neg_sum = tail_sum          # degenerate empty-heatmap guard
    else:
        rows = aligned // _LANE
        hp2 = hp.reshape(rows, _LANE)
        ht2 = ht.reshape(rows, _LANE)

        itemsize = jnp.dtype(heatmap_pred.dtype).itemsize
        sub = {4: 8, 2: 16, 1: 32}.get(itemsize, 8)   # sublane packing per dtype
        if rows >= _MAX_TILE_ROWS:
            tile_rows = _MAX_TILE_ROWS
        elif rows >= sub:
            tile_rows = (rows // sub) * sub
        else:
            tile_rows = rows                          # block == full dim (allowed)

        n_blocks = pl.cdiv(rows, tile_rows)
        n_cores_eff = max(1, min(n_cores, n_blocks))
        blocks_per_core = pl.cdiv(n_blocks, n_cores_eff)

        clamp_needed = (n_cores_eff * blocks_per_core != n_blocks)
        mask_needed = clamp_needed or (rows % tile_rows != 0)

        if clamp_needed:
            # Clamp the physical block index so we never request a fully
            # out-of-range block; the duplicated block is zeroed by the mask.
            def hm_index(c, j):
                return (jnp.minimum(c * blocks_per_core + j, n_blocks - 1), 0)
        else:
            def hm_index(c, j):
                return (c * blocks_per_core + j, 0)

        if n_cores_eff > 1:
            dim_sem = (pltpu.CORE_PARALLEL, pltpu.ARBITRARY)
        else:
            dim_sem = ("arbitrary", "arbitrary")

        kernel = partial(_gvfl_neg_kernel, alpha=alpha, gamma=gamma,
                         tile_rows=tile_rows, blocks_per_core=blocks_per_core,
                         valid_rows=rows, mask_needed=mask_needed)

        cost = pl.CostEstimate(flops=9 * aligned,
                               transcendentals=aligned,
                               bytes_accessed=2 * aligned * int(itemsize))

        partial_sums = pl.pallas_call(
            kernel,
            out_shape=jax.ShapeDtypeStruct((n_cores_eff, 1, 1), jnp.float32),
            grid_spec=pltpu.PrefetchScalarGridSpec(
                num_scalar_prefetch=0,
                grid=(n_cores_eff, blocks_per_core),
                in_specs=[
                    pl.BlockSpec((tile_rows, _LANE), hm_index),
                    pl.BlockSpec((tile_rows, _LANE), hm_index),
                ],
                out_specs=pl.BlockSpec((1, 1, 1), lambda c, j: (c, 0, 0)),
                scratch_shapes=[pltpu.VMEM((8, _LANE), jnp.float32)],
            ),
            compiler_params=pltpu.CompilerParams(
                dimension_semantics=dim_sem,
                vmem_limit_bytes=_VMEM_LIMIT_BYTES),
            cost_estimate=cost,
        )(hp2, ht2)

        neg_sum = jnp.sum(partial_sums) + tail_sum

    # ---- positive-sample term: tiny O(P) vector, plain JAX (same jit) ----
    pp = pred_posis.reshape(-1).astype(jnp.float32)
    io = iou.reshape(-1).astype(jnp.float32)
    pos = -(io * jnp.log(_EPS + pp)
            + (1.0 - io) * jnp.log(1.0 - pp + _EPS)) * io
    pos_sum = jnp.sum(pos)

    return loss_weight * (neg_sum + pos_sum)


def gaussian_varifocal_loss_pallas(heatmap_pred, pred_posis, gaussian_target,
                                   iou, *, alpha=2.0, gamma=4.0,
                                   loss_weight=1.0):
    n_cores = _detect_num_tensorcores()
    kwargs = dict(alpha=float(alpha), gamma=float(gamma),
                  loss_weight=float(loss_weight))
    try:
        return _gvfl_impl(heatmap_pred, pred_posis, gaussian_target, iou,
                          n_cores=n_cores, **kwargs)
    except Exception:
        if n_cores == 1:
            raise
        # CORE_PARALLEL unsupported on this chip/toolchain: single-core fallback.
        return _gvfl_impl(heatmap_pred, pred_posis, gaussian_target, iou,
                          n_cores=1, **kwargs)


class GaussianVariFocalLoss:
    """JAX/Pallas re-implementation of mmdet3d GaussianVariFocalLoss.

    No learnable parameters; alpha/gamma/loss_weight are hyper-parameters.
    """

    def __init__(self, alpha=2.0, gamma=4.0, reduction='mean',
                 loss_weight=1.0):
        assert reduction in ('none', 'mean', 'sum')
        self.alpha = alpha
        self.gamma = gamma
        self.reduction = reduction
        self.loss_weight = loss_weight

    def forward(self, pred, target, weight=None, avg_factor=None,
                reduction_override=None):
        assert reduction_override in (None, 'none', 'mean', 'sum')
        assert weight is None  # TODO(synk): per-element weight path not used by this loss
        heatmap_pred, pred_posis = pred
        gaussian_target, iou = target
        loss = gaussian_varifocal_loss_pallas(
            heatmap_pred, pred_posis, gaussian_target, iou,
            alpha=self.alpha, gamma=self.gamma, loss_weight=self.loss_weight)
        reduction = reduction_override if reduction_override else self.reduction
        if avg_factor is not None and reduction == 'mean':
            loss = loss / avg_factor
        # For a 0-dim summed loss, 'none'/'sum'/'mean' are otherwise identity.
        return loss

    __call__ = forward


def _reference(heatmap_pred, pred_posis, gaussian_target, iou,
               alpha=2.0, gamma=4.0, loss_weight=1.0):
    eps = 1e-12
    neg_w = (1.0 - gaussian_target) ** gamma
    neg = -jnp.log(1.0 - heatmap_pred + eps) * heatmap_pred ** alpha * neg_w
    pos = -(iou * jnp.log(eps + pred_posis)
            + (1.0 - iou) * jnp.log(1.0 - pred_posis + eps)) * iou
    return loss_weight * (jnp.sum(neg) + jnp.sum(pos))


if __name__ == "__main__":
    key = jax.random.PRNGKey(0)
    k1, k2, k3, k4 = jax.random.split(key, 4)

    # Heatmap-style prediction/target (NCHW) and positive-sample vectors.
    heatmap_pred = jax.nn.sigmoid(
        jax.random.normal(k1, (2, 4, 16, 16), dtype=jnp.float32))
    gaussian_target = jax.random.uniform(k2, (2, 4, 16, 16),
                                         dtype=jnp.float32)
    pred_posis = jax.nn.sigmoid(jax.random.normal(k3, (32,),
                                                  dtype=jnp.float32))
    iou = jax.random.uniform(k4, (32,), dtype=jnp.float32)

    loss_mod = GaussianVariFocalLoss(alpha=2.0, gamma=4.0,
                                     reduction='mean', loss_weight=1.0)
    loss = loss_mod((heatmap_pred, pred_posis), (gaussian_target, iou))
    loss = jax.block_until_ready(loss)

    ref = _reference(heatmap_pred, pred_posis, gaussian_target, iou)
    assert jnp.allclose(loss, ref, rtol=1e-5, atol=1e-5), (loss, ref)

    print("KERNEL_OK")
</pallas_src>

<mosaic_0001>
module attributes {stable_mosaic.version = 11 : i64} {
  func.func @_gvfl_neg_kernel(%arg0: i32, %arg1: i32, %arg2: memref<16x128xf32, #tpu.memory_space<vmem>>, %arg3: memref<16x128xf32, #tpu.memory_space<vmem>>, %arg4: memref<1x1x1xf32, #tpu.memory_space<vmem>>, %arg5: memref<8x128xf32, #tpu.memory_space<vmem>>) attributes {dimension_semantics = [#tpu.dimension_semantics<arbitrary>, #tpu.dimension_semantics<arbitrary>], iteration_bounds = array<i64: 1, 1>, scalar_prefetch = 0 : i64, scratch_operands = 1 : i64, tpu.core_type = #tpu.core_type<tc>, window_params = [{transform_indices = @transform_0, window_bounds = array<i64: 16, 128>}, {transform_indices = @transform_1, window_bounds = array<i64: 16, 128>}, {transform_indices = @transform_2, window_bounds = array<i64: 1, 1, 1>}]} {
    %c0_i32 = arith.constant 0 : i32
    %0 = arith.cmpi eq, %arg1, %c0_i32 : i32
    %1 = arith.extui %0 : i1 to i32
    %c0_i32_0 = arith.constant 0 : i32
    %2 = arith.cmpi ne, %1, %c0_i32_0 : i32
    scf.if %2 {
      %cst_14 = arith.constant 0.000000e+00 : f32
      %27 = vector.broadcast %cst_14 : f32 to vector<8x128xf32>
      %c0_15 = arith.constant 0 : index
      %c0_16 = arith.constant 0 : index
      %28 = vector.load %arg5[%c0_15, %c0_16] : memref<8x128xf32, #tpu.memory_space<vmem>>, vector<8x128xf32>
      tpu.vector_store %arg5[%c0_15, %c0_16], %27 {strides = array<i32>} : memref<8x128xf32, #tpu.memory_space<vmem>>, vector<8x128xf32>,
    } else {
    }
    %c0 = arith.constant 0 : index
    %c0_1 = arith.constant 0 : index
    %3 = vector.load %arg2[%c0, %c0_1] : memref<16x128xf32, #tpu.memory_space<vmem>>, vector<16x128xf32>
    %c0_2 = arith.constant 0 : index
    %c0_3 = arith.constant 0 : index
    %4 = vector.load %arg3[%c0_2, %c0_3] : memref<16x128xf32, #tpu.memory_space<vmem>>, vector<16x128xf32>
    %cst = arith.constant 1.000000e+00 : f32
    %5 = vector.broadcast %cst : f32 to vector<16x128xf32>
    %6 = arith.subf %5, %3 : vector<16x128xf32>
    %cst_4 = arith.constant 9.99999996E-13 : f32
    %7 = vector.broadcast %cst_4 : f32 to vector<16x128xf32>
    %8 = arith.addf %6, %7 : vector<16x128xf32>
    %9 = math.log %8 : vector<16x128xf32>
    %cst_5 = arith.constant 0.000000e+00 : f32
    %10 = vector.broadcast %cst_5 : f32 to vector<16x128xf32>
    %11 = arith.subf %10, %9 : vector<16x128xf32>
    %12 = arith.mulf %3, %3 : vector<16x128xf32>
    %13 = arith.mulf %11, %12 : vector<16x128xf32>
    %cst_6 = arith.constant 1.000000e+00 : f32
    %14 = vector.broadcast %cst_6 : f32 to vector<16x128xf32>
    %15 = arith.subf %14, %4 : vector<16x128xf32>
    %16 = arith.mulf %15, %15 : vector<16x128xf32>
    %17 = arith.mulf %16, %16 : vector<16x128xf32>
    %18 = arith.mulf %13, %17 : vector<16x128xf32>
    %c0_7 = arith.constant 0 : index
    %c0_8 = arith.constant 0 : index
    %19 = vector.load %arg5[%c0_7, %c0_8] : memref<8x128xf32, #tpu.memory_space<vmem>>, vector<8x128xf32>
    %20 = vector.shape_cast %18 : vector<16x128xf32> to vector<2x8x128xf32>
    %cst_9 = arith.constant dense<0.000000e+00> : vector<8x128xf32>
    %21 = vector.multi_reduction <add>, %20, %cst_9 [0] : vector<2x8x128xf32> to vector<8x128xf32>
    %22 = arith.addf %19, %21 : vector<8x128xf32>
    %c0_10 = arith.constant 0 : index
    %c0_11 = arith.constant 0 : index
    %23 = vector.load %arg5[%c0_10, %c0_11] : memref<8x128xf32, #tpu.memory_space<vmem>>, vector<8x128xf32>
    tpu.vector_store %arg5[%c0_10, %c0_11], %22 {strides = array<i32>} : memref<8x128xf32, #tpu.memory_space<vmem>>, vector<8x128xf32>,
    %c0_i32_12 = arith.constant 0 : i32
    %24 = arith.cmpi eq, %arg1, %c0_i32_12 : i32
    %25 = arith.extui %24 : i1 to i32
    %c0_i32_13 = arith.constant 0 : i32
    %26 = arith.cmpi ne, %25, %c0_i32_13 : i32
    scf.if %26 {
      %c0_14 = arith.constant 0 : index
      %c0_15 = arith.constant 0 : index
      %27 = vector.load %arg5[%c0_14, %c0_15] : memref<8x128xf32, #tpu.memory_space<vmem>>, vector<8x128xf32>
      %28 = vector.shape_cast %27 : vector<8x128xf32> to vector<1x8x128xf32>
      %cst_16 = arith.constant dense<0.000000e+00> : vector<1xf32>
      %29 = vector.multi_reduction <add>, %28, %cst_16 [1, 2] : vector<1x8x128xf32> to vector<1xf32>
      %30 = vector.shape_cast %29 : vector<1xf32> to vector<1x1x1xf32>
      %31 = vector.extract %30[0, 0, 0] : f32 from vector<1x1x1xf32>
      %32 = vector.broadcast %31 : f32 to vector<1x1x1xf32>
      %c0_17 = arith.constant 0 : index
      %c0_18 = arith.constant 0 : index
      %c0_19 = arith.constant 0 : index
      %33 = vector.load %arg4[%c0_17, %c0_18, %c0_19] : memref<1x1x1xf32, #tpu.memory_space<vmem>>, vector<1x1x1xf32>
      tpu.vector_store %arg4[%c0_17, %c0_18, %c0_19], %32 {strides = array<i32>} : memref<1x1x1xf32, #tpu.memory_space<vmem>>, vector<1x1x1xf32>,
    } else {
    }
    return
  }
  func.func @transform_0(%arg0: i32, %arg1: i32) -> (i32, i32) {
    %c1_i32 = arith.constant 1 : i32
    %0 = arith.muli %arg0, %c1_i32 : i32
    %1 = arith.addi %0, %arg1 : i32
    %c0_i32 = arith.constant 0 : i32
    %c0_i32_0 = arith.constant 0 : i32
    return %1, %c0_i32 : i32, i32
  }
  func.func @transform_1(%arg0: i32, %arg1: i32) -> (i32, i32) {
    %c1_i32 = arith.constant 1 : i32
    %0 = arith.muli %arg0, %c1_i32 : i32
    %1 = arith.addi %0, %arg1 : i32
    %c0_i32 = arith.constant 0 : i32
    %c0_i32_0 = arith.constant 0 : i32
    return %1, %c0_i32 : i32, i32
  }
  func.func @transform_2(%arg0: i32, %arg1: i32) -> (i32, i32, i32) {
    %c0_i32 = arith.constant 0 : i32
    %c0_i32_0 = arith.constant 0 : i32
    %c0_i32_1 = arith.constant 0 : i32
    return %arg0, %c0_i32, %c0_i32_0 : i32, i32, i32
  }
}

</mosaic_0001>

<bundles_post_ra>
// kernel: _gvfl_impl.1
= control target key start
LH: loop header
LB: loop body
LE: loop exit
PB: predicated region body
PF: predicated region fallthrough
CT: control target
= control target key end

     0   :  { %s193_s0 = inlined_call_operand.vmem [shape: f32[16,128], index: 0, kind: input, shape index: {}]   ;;  %s194_s1 = inlined_call_operand.vmem [shape: f32[16,128], index: 1, kind: input, shape index: {}]   ;;  %s195_s2 = inlined_call_operand.hbm [shape: f32[1,1,1], index: 2, kind: output, shape index: {}]  }
   0x1   :  { %v61_v0 = vld [vmem:[%s193_s0] sm:$0xff]  ;;  %v62_v1 = vld [vmem:[%s193_s0 + $0x8] sm:$0xff] }
   0x2   :  { %v65_v2 = vsub.f32 1.0, %v61_v0  ;;  %v66_v3 = vsub.f32 1.0, %v62_v1 }
   0x3   :  { %7 = vsyncpa [#allocation4], 0  ;;  %v63_v6 = vld [vmem:[%s194_s1] sm:$0xff]  ;;  %v64_v7 = vld [vmem:[%s194_s1 + $0x8] sm:$0xff]  ;;  %v75_v15 = vmul.f32 %v61_v0, %v61_v0  ;;  %v76_v17 = vmul.f32 %v62_v1, %v62_v1  ;;  %s162_s0 = smov [#allocation3]   ;;  %vm105_vm0 = vcmask 0  }
   0x4   :  { %v67_v4 = vadd.f32 1e-12, %v65_v2  ;;  %v68_v5 = vadd.f32 1e-12, %v66_v3  ;;  %v79_v8 = vsub.f32 1.0, %v63_v6  ;;  %v80_v9 = vsub.f32 1.0, %v64_v7 }
   0x5   :  { %s113_s1 = sshll.u32 %s162_s0, 4  ;;  %s114_s1 = int_to_ptr.vmem [resolvable:$true] %s113_s1 }
   0x6   :  { %136 = vlog2.f32 %v67_v4  ;;  %v81_v10 = vmul.f32 %v79_v8, %v79_v8  ;;  %v82_v12 = vmul.f32 %v80_v9, %v80_v9  ;;  %s140_s18 = scalar_lea.vmem %s114_s1, 16  ;;  %s144_s19 = scalar_lea.vmem %s114_s1, 32 }
   0x7   :  { %138 = vlog2.f32 %v68_v5  ;;  %p141_p0 = scmp.ne.s32.totalorder %s114_s1, %s140_s18  ;;  %p145_p1 = scmp.lt.s32.totalorder %s114_s1, %s114_s1 }
   0x8   :  { %v83_v19 = vmul.f32 %v81_v10, %v81_v10  ;;  %v84_v21 = vmul.f32 %v82_v12, %v82_v12  ;;  %p146_p2 = scmp.lt.s32.totalorder %s144_s19, %s140_s18 }
   0xa   :  { %p147_p3 = por %p146_p2, %p145_p1 }
   0xc   :  { %p148_p4 = pnand %p147_p3, %p141_p0 }
  0x13   :  { %v137_v11 = vpop.eup %136 }
  0x14   :  { %v139_v13 = vpop.eup %138  ;;  %v70_v14 = vmul.f32 0.6931472, %v137_v11 }
  0x15   :  { %v72_v16 = vmul.f32 0.6931472, %v139_v13 }
  0x16   :  { %v73_v18 = vsub.f32 0.0, %v70_v14 }
  0x17   :  { %v74_v20 = vsub.f32 0.0, %v72_v16 }
  0x18   :  { %v77_v22 = vmul.f32 %v75_v15, %v73_v18 }
  0x19   :  { %v78_v23 = vmul.f32 %v76_v17, %v74_v20 }
  0x1a   :  { %v85_v24 = vmul.f32 %v83_v19, %v77_v22 }
  0x1b   :  { %v86_v25 = vmul.f32 %v84_v21, %v78_v23 }
  0x1d   :  { %v88_v26 = vadd.f32 %v86_v25, %v85_v24 }
  0x1f   :  { %95 = vadd.xlane.f32.xlu0 %v88_v26 }
  0xa8   :  { %v96_v27 = vpop.xlane.xlu0 %95 }
  0xa9   :  { %v97_v28 = vrot.slane %v96_v27, 4 }
  0xab   :  { %v98_v29 = vadd.f32 %v97_v28, %v96_v27 }
  0xad   :  { %v99_v30 = vrot.slane %v98_v29, 2 }
  0xaf   :  { %v100_v31 = vadd.f32 %v99_v30, %v98_v29 }
  0xb1   :  { %v101_v32 = vrot.slane %v100_v31, 1 }
  0xb3   :  { %v102_v33 = vadd.f32 %v101_v32, %v100_v31 }
  0xb5   :  { %133 = vpush %v102_v33 }
  0xe6   :  { %s134_s17 = spop %133 }
  0xe7   :  { %v104_v34 = vstv %s134_s17 }
  0xe8   :  { %106 = vst.msk [vmem:[#allocation3] sm:$0x1] %vm105_vm0, %v104_v34 }
  0xe9   :  { %151 = shalt.err (!%p148_p4)
}
  0xea   :  { %116 = dma.vmem_to_hbm [thread:$0]  %s114_s1, 16, %s195_s2, [#allocation4]  }
  0xeb   :  { %160 = dma.done.wait [#allocation4], 16  }
  0xec   :  { %161 = vsyncadd [#allocation4], 4294967280 }
  0xed   :  { %120 = vsyncpa [#allocation4], 1 }

</bundles_post_ra>
